<compile_context>
chip_gen: v7x
topology: tpu7x:2x2x1
jax: 0.10.0
libtpu: 0.0.40
codegen_flags: <defaults>
</compile_context>

<pallas_src>
import functools
import math

import jax
import jax.numpy as jnp
from jax.experimental import pallas as pl
from jax.experimental.pallas import tpu as pltpu

IGNORE_LB = 255
_SUB = 8               # sublane rows per tile
_PIX_ALIGN = _SUB * 128   # pad H*W to a multiple of 1024


# ---------------------------------------------------------------------------
# Pallas kernel: fused per-pixel cross-entropy for two label maps + per-tile
# OHEM ">thresh" partial sums/counts.
#   logits_ref : (C, 8, T)   f32      -- channels on the leading axis
#   lab_*_ref  : (8, T)      int32
#   loss_*_ref : (8, T)      f32
#   stats_ref  : (8, 128)    f32      -- lanes 0..3 = sum_a, cnt_a, sum_b, cnt_b
#                                        (per-sublane partials; summed in XLA)
# ---------------------------------------------------------------------------
def _ce2_kernel(logits_ref, lab_a_ref, lab_b_ref,
                loss_a_ref, loss_b_ref, stats_ref, *, thresh):
    C = logits_ref.shape[0]

    x0 = logits_ref[0].astype(jnp.float32)                    # (8, T)
    m = x0
    for c in range(1, C):                                     # unrolled, VPU only
        m = jnp.maximum(m, logits_ref[c].astype(jnp.float32))
    s = jnp.exp(x0 - m)                                        # EUP
    for c in range(1, C):
        s = s + jnp.exp(logits_ref[c].astype(jnp.float32) - m)
    lse = m + jnp.log(s)                                       # (8, T)

    def emit(lab_ref, out_ref):
        lab = lab_ref[...]                                     # (8, T) int32
        picked = x0
        for c in range(1, C):                                  # unrolled select
            picked = jnp.where(lab == c,
                               logits_ref[c].astype(jnp.float32), picked)
        # ignore_index=255 -> loss 0 (matches CrossEntropyLoss reduction='none')
        loss = jnp.where(lab == IGNORE_LB, 0.0, lse - picked)
        out_ref[...] = loss
        gt = loss > thresh
        s_gt = jnp.sum(jnp.where(gt, loss, 0.0), axis=1, keepdims=True)  # (8,1)
        c_gt = jnp.sum(gt.astype(jnp.float32), axis=1, keepdims=True)    # (8,1)
        return s_gt, c_gt

    sa, ca = emit(lab_a_ref, loss_a_ref)
    sb, cb = emit(lab_b_ref, loss_b_ref)

    col = jax.lax.broadcasted_iota(jnp.int32, (_SUB, 128), 1)
    stats_ref[...] = jnp.where(col == 0, sa,
                      jnp.where(col == 1, ca,
                       jnp.where(col == 2, sb, cb)))


def _pick_tile(lanes):
    # Largest lane count dividing the (padded) lane extent; targets ~1-4 MiB of
    # real data per grid step while keeping double-buffered VMEM well under the
    # scoped limit on every generation.  `lanes` is always a multiple of 128.
    for t in (16384, 8192, 4096, 2048, 1024, 512, 256, 128):
        if lanes % t == 0:
            return t
    return 128  # unreachable after padding


def fused_per_pixel_ce(logits_nchw, labels_a_nhw, labels_b_nhw, thresh):
    """Per-pixel CE for both label maps (lane-dense (N, 8, HWp/8) layout) plus
    the fused OHEM >thresh partial sums/counts for each map."""
    N, C, H, W = logits_nchw.shape
    HW = H * W
    HWp = ((HW + _PIX_ALIGN - 1) // _PIX_ALIGN) * _PIX_ALIGN
    pad = HWp - HW

    # Pure reshapes (no transpose); only cast labels if they are not int32.
    logits = logits_nchw.reshape(N, C, HW)
    lab_a = labels_a_nhw.reshape(N, HW)
    lab_b = labels_b_nhw.reshape(N, HW)
    if lab_a.dtype != jnp.int32:
        lab_a = lab_a.astype(jnp.int32)
    if lab_b.dtype != jnp.int32:
        lab_b = lab_b.astype(jnp.int32)
    if pad:
        # Padded pixels carry label 255 -> zero loss -> no effect on OHEM.
        logits = jnp.pad(logits, ((0, 0), (0, 0), (0, pad)))
        lab_a = jnp.pad(lab_a, ((0, 0), (0, pad)), constant_values=IGNORE_LB)
        lab_b = jnp.pad(lab_b, ((0, 0), (0, pad)), constant_values=IGNORE_LB)

    Lp = HWp // _SUB
    logits = logits.reshape(N, C, _SUB, Lp)
    lab_a = lab_a.reshape(N, _SUB, Lp)
    lab_b = lab_b.reshape(N, _SUB, Lp)

    sub_t = _pick_tile(Lp)
    num_tiles = Lp // sub_t
    # Grid = (N, num_tiles), both "parallel" -> megacore-shardable on v7x.
    grid = (N, num_tiles)

    lab_spec = pl.BlockSpec((None, _SUB, sub_t), lambda n, i: (n, 0, i))
    loss_spec = pl.BlockSpec((None, _SUB, sub_t), lambda n, i: (n, 0, i))

    loss_a, loss_b, stats = pl.pallas_call(
        functools.partial(_ce2_kernel, thresh=thresh),
        out_shape=(jax.ShapeDtypeStruct((N, _SUB, Lp), jnp.float32),
                   jax.ShapeDtypeStruct((N, _SUB, Lp), jnp.float32),
                   jax.ShapeDtypeStruct((N, _SUB, num_tiles * 128), jnp.float32)),
        grid_spec=pltpu.PrefetchScalarGridSpec(
            num_scalar_prefetch=0,
            grid=grid,
            in_specs=[
                pl.BlockSpec((None, C, _SUB, sub_t), lambda n, i: (n, 0, 0, i)),
                lab_spec,
                lab_spec,
            ],
            out_specs=[
                loss_spec,
                loss_spec,
                pl.BlockSpec((None, _SUB, 128), lambda n, i: (n, 0, i)),
            ],
        ),
        compiler_params=pltpu.CompilerParams(
            dimension_semantics=("parallel", "parallel"),
            vmem_limit_bytes=32 * 1024 * 1024),
    )(logits, lab_a, lab_b)

    # Tiny per-tile partials -> 4 scalars.
    st = stats.reshape(N, _SUB, num_tiles, 128)
    sum_a = jnp.sum(st[..., 0])
    cnt_a = jnp.sum(st[..., 1])
    sum_b = jnp.sum(st[..., 2])
    cnt_b = jnp.sum(st[..., 3])
    return loss_a, loss_b, (sum_a, cnt_a, sum_b, cnt_b)


# ---------------------------------------------------------------------------
# OHEM selection from per-pixel losses + fused >thresh statistics.
# Hierarchical (exact) top-k instead of a global sort over N*H*W.
# ---------------------------------------------------------------------------
def _ohem_from_stats(loss_3d, sum_gt, cnt_gt, n_min, total_real):
    Nn, SUB, L = loss_3d.shape
    # PyTorch would index-error if n_min >= numel; clamp statically instead.
    n_min = min(n_min, total_real - 1)
    k_row = min(n_min + 1, L)
    rows = loss_3d.reshape(Nn * SUB, L)              # leading-dim collapse, no relayout
    part, _ = jax.lax.top_k(rows, k_row)             # (rows, k_row), exact superset
    topk, _ = jax.lax.top_k(part.reshape(-1), n_min + 1)
    mean_topk = jnp.mean(topk[:n_min])
    # branch A: mean of losses > thresh (count/sum computed inside the kernel)
    mean_gt = sum_gt / jnp.maximum(cnt_gt, 1.0)
    # loss_sorted[n_min] > thresh  <=>  (#losses > thresh) > n_min   (losses >= 0)
    return jnp.where(cnt_gt > float(n_min), mean_gt, mean_topk)


# ---------------------------------------------------------------------------
# BCE (mean) for the tiny classification heads: left to XLA fusion on purpose
# (N*K elements; a pallas_call launch would dwarf the math).
# ---------------------------------------------------------------------------
def bce_mean(pred, target):
    # PyTorch BCELoss clamps the log terms at -100
    logp = jnp.maximum(jnp.log(pred), -100.0)
    log1mp = jnp.maximum(jnp.log(1.0 - pred), -100.0)
    return jnp.mean(-(target * logp + (1.0 - target) * log1mp))


# ---------------------------------------------------------------------------
# GlobLoss forward
# ---------------------------------------------------------------------------
@functools.partial(jax.jit, static_argnames=("thresh_ohem", "n_min_ohem"))
def glob_loss(logits, locationmap, pred_mask, clabel,
              pred_c1, pred_c2, pred_c3, pred_c4,
              thresh_ohem=0.7, n_min_ohem=64):
    N, C, H, W = logits.shape
    thresh = -math.log(float(thresh_ohem))

    # One fused pass over the logits for both OHEM CE losses + >thresh stats.
    loss_a, loss_b, (sum_a, cnt_a, sum_b, cnt_b) = fused_per_pixel_ce(
        logits, locationmap, pred_mask, thresh)
    total_real = N * H * W
    loss_lm = _ohem_from_stats(loss_a, sum_a, cnt_a, n_min_ohem, total_real)
    loss_pm = _ohem_from_stats(loss_b, sum_b, cnt_b, n_min_ohem, total_real)

    clab = clabel.astype(jnp.float32)
    bce = (bce_mean(pred_c1, clab) + bce_mean(pred_c2, clab)
           + bce_mean(pred_c3, clab) + bce_mean(pred_c4, clab))

    return loss_lm + loss_pm + bce


if __name__ == "__main__":
    key = jax.random.PRNGKey(0)
    N, C, H, W = 2, 4, 16, 16          # segmentation logits (NCHW like PyTorch)
    K = 4                               # classification head width for BCE

    k1, k2, k3, k4, k5, k6 = jax.random.split(key, 6)
    logits = jax.random.normal(k1, (N, C, H, W), jnp.float32)

    locationmap = jax.random.randint(k2, (N, H, W), 0, C, jnp.int32)
    # sprinkle some ignore pixels
    ignore_mask = jax.random.bernoulli(k3, 0.1, (N, H, W))
    locationmap = jnp.where(ignore_mask, IGNORE_LB, locationmap)

    pred_mask = jax.random.randint(k4, (N, H, W), 0, C, jnp.int32)

    clabel = jax.random.bernoulli(k5, 0.5, (N, K)).astype(jnp.float32)
    pk = jax.random.split(k6, 4)
    pred_c1 = jax.nn.sigmoid(jax.random.normal(pk[0], (N, K), jnp.float32))
    pred_c2 = jax.nn.sigmoid(jax.random.normal(pk[1], (N, K), jnp.float32))
    pred_c3 = jax.nn.sigmoid(jax.random.normal(pk[2], (N, K), jnp.float32))
    pred_c4 = jax.nn.sigmoid(jax.random.normal(pk[3], (N, K), jnp.float32))

    out = glob_loss(logits, locationmap, pred_mask, clabel,
                    pred_c1, pred_c2, pred_c3, pred_c4,
                    thresh_ohem=0.7, n_min_ohem=64)
    jax.block_until_ready(out)
    print("KERNEL_OK")
</pallas_src>

<mosaic_0001>
module attributes {stable_mosaic.version = 11 : i64} {
  func.func @_ce2_kernel(%arg0: i32, %arg1: i32, %arg2: memref<1x4x8x128xf32, #tpu.memory_space<vmem>>, %arg3: memref<1x8x128xi32, #tpu.memory_space<vmem>>, %arg4: memref<1x8x128xi32, #tpu.memory_space<vmem>>, %arg5: memref<1x8x128xf32, #tpu.memory_space<vmem>>, %arg6: memref<1x8x128xf32, #tpu.memory_space<vmem>>, %arg7: memref<1x8x128xf32, #tpu.memory_space<vmem>>) attributes {dimension_semantics = [#tpu.dimension_semantics<parallel>, #tpu.dimension_semantics<parallel>], iteration_bounds = array<i64: 2, 1>, scalar_prefetch = 0 : i64, scratch_operands = 0 : i64, tpu.core_type = #tpu.core_type<tc>, window_params = [{transform_indices = @transform_0, window_bounds = array<i64: 1, 4, 8, 128>}, {transform_indices = @transform_1, window_bounds = array<i64: 1, 8, 128>}, {transform_indices = @transform_2, window_bounds = array<i64: 1, 8, 128>}, {transform_indices = @transform_3, window_bounds = array<i64: 1, 8, 128>}, {transform_indices = @transform_4, window_bounds = array<i64: 1, 8, 128>}, {transform_indices = @transform_5, window_bounds = array<i64: 1, 8, 128>}]} {
    %c0 = arith.constant 0 : index
    %c0_0 = arith.constant 0 : index
    %c0_1 = arith.constant 0 : index
    %c0_2 = arith.constant 0 : index
    %0 = vector.load %arg2[%c0, %c0_0, %c0_1, %c0_2] : memref<1x4x8x128xf32, #tpu.memory_space<vmem>>, vector<1x1x8x128xf32>
    %1 = vector.shape_cast %0 : vector<1x1x8x128xf32> to vector<8x128xf32>
    %c0_3 = arith.constant 0 : index
    %c1 = arith.constant 1 : index
    %c0_4 = arith.constant 0 : index
    %c0_5 = arith.constant 0 : index
    %2 = vector.load %arg2[%c0_3, %c1, %c0_4, %c0_5] : memref<1x4x8x128xf32, #tpu.memory_space<vmem>>, vector<1x1x8x128xf32>
    %3 = vector.shape_cast %2 : vector<1x1x8x128xf32> to vector<8x128xf32>
    %4 = arith.maximumf %1, %3 : vector<8x128xf32>
    %c0_6 = arith.constant 0 : index
    %c2 = arith.constant 2 : index
    %c0_7 = arith.constant 0 : index
    %c0_8 = arith.constant 0 : index
    %5 = vector.load %arg2[%c0_6, %c2, %c0_7, %c0_8] : memref<1x4x8x128xf32, #tpu.memory_space<vmem>>, vector<1x1x8x128xf32>
    %6 = vector.shape_cast %5 : vector<1x1x8x128xf32> to vector<8x128xf32>
    %7 = arith.maximumf %4, %6 : vector<8x128xf32>
    %c0_9 = arith.constant 0 : index
    %c3 = arith.constant 3 : index
    %c0_10 = arith.constant 0 : index
    %c0_11 = arith.constant 0 : index
    %8 = vector.load %arg2[%c0_9, %c3, %c0_10, %c0_11] : memref<1x4x8x128xf32, #tpu.memory_space<vmem>>, vector<1x1x8x128xf32>
    %9 = vector.shape_cast %8 : vector<1x1x8x128xf32> to vector<8x128xf32>
    %10 = arith.maximumf %7, %9 : vector<8x128xf32>
    %11 = arith.subf %1, %10 : vector<8x128xf32>
    %12 = math.exp %11 : vector<8x128xf32>
    %c0_12 = arith.constant 0 : index
    %c1_13 = arith.constant 1 : index
    %c0_14 = arith.constant 0 : index
    %c0_15 = arith.constant 0 : index
    %13 = vector.load %arg2[%c0_12, %c1_13, %c0_14, %c0_15] : memref<1x4x8x128xf32, #tpu.memory_space<vmem>>, vector<1x1x8x128xf32>
    %14 = vector.shape_cast %13 : vector<1x1x8x128xf32> to vector<8x128xf32>
    %15 = arith.subf %14, %10 : vector<8x128xf32>
    %16 = math.exp %15 : vector<8x128xf32>
    %17 = arith.addf %12, %16 : vector<8x128xf32>
    %c0_16 = arith.constant 0 : index
    %c2_17 = arith.constant 2 : index
    %c0_18 = arith.constant 0 : index
    %c0_19 = arith.constant 0 : index
    %18 = vector.load %arg2[%c0_16, %c2_17, %c0_18, %c0_19] : memref<1x4x8x128xf32, #tpu.memory_space<vmem>>, vector<1x1x8x128xf32>
    %19 = vector.shape_cast %18 : vector<1x1x8x128xf32> to vector<8x128xf32>
    %20 = arith.subf %19, %10 : vector<8x128xf32>
    %21 = math.exp %20 : vector<8x128xf32>
    %22 = arith.addf %17, %21 : vector<8x128xf32>
    %c0_20 = arith.constant 0 : index
    %c3_21 = arith.constant 3 : index
    %c0_22 = arith.constant 0 : index
    %c0_23 = arith.constant 0 : index
    %23 = vector.load %arg2[%c0_20, %c3_21, %c0_22, %c0_23] : memref<1x4x8x128xf32, #tpu.memory_space<vmem>>, vector<1x1x8x128xf32>
    %24 = vector.shape_cast %23 : vector<1x1x8x128xf32> to vector<8x128xf32>
    %25 = arith.subf %24, %10 : vector<8x128xf32>
    %26 = math.exp %25 : vector<8x128xf32>
    %27 = arith.addf %22, %26 : vector<8x128xf32>
    %28 = math.log %27 : vector<8x128xf32>
    %29 = arith.addf %10, %28 : vector<8x128xf32>
    %c0_24 = arith.constant 0 : index
    %c0_25 = arith.constant 0 : index
    %c0_26 = arith.constant 0 : index
    %30 = vector.load %arg3[%c0_24, %c0_25, %c0_26] : memref<1x8x128xi32, #tpu.memory_space<vmem>>, vector<1x8x128xi32>
    %31 = vector.shape_cast %30 : vector<1x8x128xi32> to vector<8x128xi32>
    %c1_i32 = arith.constant 1 : i32
    %32 = vector.broadcast %c1_i32 : i32 to vector<8x128xi32>
    %33 = arith.cmpi eq, %31, %32 : vector<8x128xi32>
    %c0_27 = arith.constant 0 : index
    %c1_28 = arith.constant 1 : index
    %c0_29 = arith.constant 0 : index
    %c0_30 = arith.constant 0 : index
    %34 = vector.load %arg2[%c0_27, %c1_28, %c0_29, %c0_30] : memref<1x4x8x128xf32, #tpu.memory_space<vmem>>, vector<1x1x8x128xf32>
    %35 = vector.shape_cast %34 : vector<1x1x8x128xf32> to vector<8x128xf32>
    %36 = arith.select %33, %35, %1 : vector<8x128xi1>, vector<8x128xf32>
    %c2_i32 = arith.constant 2 : i32
    %37 = vector.broadcast %c2_i32 : i32 to vector<8x128xi32>
    %38 = arith.cmpi eq, %31, %37 : vector<8x128xi32>
    %c0_31 = arith.constant 0 : index
    %c2_32 = arith.constant 2 : index
    %c0_33 = arith.constant 0 : index
    %c0_34 = arith.constant 0 : index
    %39 = vector.load %arg2[%c0_31, %c2_32, %c0_33, %c0_34] : memref<1x4x8x128xf32, #tpu.memory_space<vmem>>, vector<1x1x8x128xf32>
    %40 = vector.shape_cast %39 : vector<1x1x8x128xf32> to vector<8x128xf32>
    %41 = arith.select %38, %40, %36 : vector<8x128xi1>, vector<8x128xf32>
    %c3_i32 = arith.constant 3 : i32
    %42 = vector.broadcast %c3_i32 : i32 to vector<8x128xi32>
    %43 = arith.cmpi eq, %31, %42 : vector<8x128xi32>
    %c0_35 = arith.constant 0 : index
    %c3_36 = arith.constant 3 : index
    %c0_37 = arith.constant 0 : index
    %c0_38 = arith.constant 0 : index
    %44 = vector.load %arg2[%c0_35, %c3_36, %c0_37, %c0_38] : memref<1x4x8x128xf32, #tpu.memory_space<vmem>>, vector<1x1x8x128xf32>
    %45 = vector.shape_cast %44 : vector<1x1x8x128xf32> to vector<8x128xf32>
    %46 = arith.select %43, %45, %41 : vector<8x128xi1>, vector<8x128xf32>
    %c255_i32 = arith.constant 255 : i32
    %47 = vector.broadcast %c255_i32 : i32 to vector<8x128xi32>
    %48 = arith.cmpi eq, %31, %47 : vector<8x128xi32>
    %49 = arith.subf %29, %46 : vector<8x128xf32>
    %cst = arith.constant 0.000000e+00 : f32
    %50 = vector.broadcast %cst : f32 to vector<8x128xf32>
    %51 = arith.select %48, %50, %49 : vector<8x128xi1>, vector<8x128xf32>
    %c0_39 = arith.constant 0 : index
    %c0_40 = arith.constant 0 : index
    %c0_41 = arith.constant 0 : index
    %52 = vector.load %arg5[%c0_39, %c0_40, %c0_41] : memref<1x8x128xf32, #tpu.memory_space<vmem>>, vector<1x8x128xf32>
    %53 = vector.shape_cast %52 : vector<1x8x128xf32> to vector<8x128xf32>
    %54 = vector.shape_cast %51 : vector<8x128xf32> to vector<1x8x128xf32>
    tpu.vector_store %arg5[%c0_39, %c0_40, %c0_41], %54 {strides = array<i32>} : memref<1x8x128xf32, #tpu.memory_space<vmem>>, vector<1x8x128xf32>,
    %cst_42 = arith.constant 0.356674939 : f32
    %55 = vector.broadcast %cst_42 : f32 to vector<8x128xf32>
    %56 = arith.cmpf ogt, %51, %55 : vector<8x128xf32>
    %cst_43 = arith.constant 0.000000e+00 : f32
    %57 = vector.broadcast %cst_43 : f32 to vector<8x128xf32>
    %58 = arith.select %56, %51, %57 : vector<8x128xi1>, vector<8x128xf32>
    %cst_44 = arith.constant dense<0.000000e+00> : vector<8xf32>
    %59 = vector.multi_reduction <add>, %58, %cst_44 [1] : vector<8x128xf32> to vector<8xf32>
    %60 = vector.shape_cast %59 : vector<8xf32> to vector<8x1xf32>
    %61 = arith.extui %56 : vector<8x128xi1> to vector<8x128xi32>
    %62 = arith.sitofp %61 : vector<8x128xi32> to vector<8x128xf32>
    %cst_45 = arith.constant dense<0.000000e+00> : vector<8xf32>
    %63 = vector.multi_reduction <add>, %62, %cst_45 [1] : vector<8x128xf32> to vector<8xf32>
    %64 = vector.shape_cast %63 : vector<8xf32> to vector<8x1xf32>
    %c0_46 = arith.constant 0 : index
    %c0_47 = arith.constant 0 : index
    %c0_48 = arith.constant 0 : index
    %65 = vector.load %arg4[%c0_46, %c0_47, %c0_48] : memref<1x8x128xi32, #tpu.memory_space<vmem>>, vector<1x8x128xi32>
    %66 = vector.shape_cast %65 : vector<1x8x128xi32> to vector<8x128xi32>
    %c1_i32_49 = arith.constant 1 : i32
    %67 = vector.broadcast %c1_i32_49 : i32 to vector<8x128xi32>
    %68 = arith.cmpi eq, %66, %67 : vector<8x128xi32>
    %c0_50 = arith.constant 0 : index
    %c1_51 = arith.constant 1 : index
    %c0_52 = arith.constant 0 : index
    %c0_53 = arith.constant 0 : index
    %69 = vector.load %arg2[%c0_50, %c1_51, %c0_52, %c0_53] : memref<1x4x8x128xf32, #tpu.memory_space<vmem>>, vector<1x1x8x128xf32>
    %70 = vector.shape_cast %69 : vector<1x1x8x128xf32> to vector<8x128xf32>
    %71 = arith.select %68, %70, %1 : vector<8x128xi1>, vector<8x128xf32>
    %c2_i32_54 = arith.constant 2 : i32
    %72 = vector.broadcast %c2_i32_54 : i32 to vector<8x128xi32>
    %73 = arith.cmpi eq, %66, %72 : vector<8x128xi32>
    %c0_55 = arith.constant 0 : index
    %c2_56 = arith.constant 2 : index
    %c0_57 = arith.constant 0 : index
    %c0_58 = arith.constant 0 : index
    %74 = vector.load %arg2[%c0_55, %c2_56, %c0_57, %c0_58] : memref<1x4x8x128xf32, #tpu.memory_space<vmem>>, vector<1x1x8x128xf32>
    %75 = vector.shape_cast %74 : vector<1x1x8x128xf32> to vector<8x128xf32>
    %76 = arith.select %73, %75, %71 : vector<8x128xi1>, vector<8x128xf32>
    %c3_i32_59 = arith.constant 3 : i32
    %77 = vector.broadcast %c3_i32_59 : i32 to vector<8x128xi32>
    %78 = arith.cmpi eq, %66, %77 : vector<8x128xi32>
    %c0_60 = arith.constant 0 : index
    %c3_61 = arith.constant 3 : index
    %c0_62 = arith.constant 0 : index
    %c0_63 = arith.constant 0 : index
    %79 = vector.load %arg2[%c0_60, %c3_61, %c0_62, %c0_63] : memref<1x4x8x128xf32, #tpu.memory_space<vmem>>, vector<1x1x8x128xf32>
    %80 = vector.shape_cast %79 : vector<1x1x8x128xf32> to vector<8x128xf32>
    %81 = arith.select %78, %80, %76 : vector<8x128xi1>, vector<8x128xf32>
    %c255_i32_64 = arith.constant 255 : i32
    %82 = vector.broadcast %c255_i32_64 : i32 to vector<8x128xi32>
    %83 = arith.cmpi eq, %66, %82 : vector<8x128xi32>
    %84 = arith.subf %29, %81 : vector<8x128xf32>
    %cst_65 = arith.constant 0.000000e+00 : f32
    %85 = vector.broadcast %cst_65 : f32 to vector<8x128xf32>
    %86 = arith.select %83, %85, %84 : vector<8x128xi1>, vector<8x128xf32>
    %c0_66 = arith.constant 0 : index
    %c0_67 = arith.constant 0 : index
    %c0_68 = arith.constant 0 : index
    %87 = vector.load %arg6[%c0_66, %c0_67, %c0_68] : memref<1x8x128xf32, #tpu.memory_space<vmem>>, vector<1x8x128xf32>
    %88 = vector.shape_cast %87 : vector<1x8x128xf32> to vector<8x128xf32>
    %89 = vector.shape_cast %86 : vector<8x128xf32> to vector<1x8x128xf32>
    tpu.vector_store %arg6[%c0_66, %c0_67, %c0_68], %89 {strides = array<i32>} : memref<1x8x128xf32, #tpu.memory_space<vmem>>, vector<1x8x128xf32>,
    %cst_69 = arith.constant 0.356674939 : f32
    %90 = vector.broadcast %cst_69 : f32 to vector<8x128xf32>
    %91 = arith.cmpf ogt, %86, %90 : vector<8x128xf32>
    %cst_70 = arith.constant 0.000000e+00 : f32
    %92 = vector.broadcast %cst_70 : f32 to vector<8x128xf32>
    %93 = arith.select %91, %86, %92 : vector<8x128xi1>, vector<8x128xf32>
    %cst_71 = arith.constant dense<0.000000e+00> : vector<8xf32>
    %94 = vector.multi_reduction <add>, %93, %cst_71 [1] : vector<8x128xf32> to vector<8xf32>
    %95 = vector.shape_cast %94 : vector<8xf32> to vector<8x1xf32>
    %96 = arith.extui %91 : vector<8x128xi1> to vector<8x128xi32>
    %97 = arith.sitofp %96 : vector<8x128xi32> to vector<8x128xf32>
    %cst_72 = arith.constant dense<0.000000e+00> : vector<8xf32>
    %98 = vector.multi_reduction <add>, %97, %cst_72 [1] : vector<8x128xf32> to vector<8xf32>
    %99 = vector.shape_cast %98 : vector<8xf32> to vector<8x1xf32>
    %100 = tpu.iota {dimensions = array<i32: 1>} : vector<8x128xi32>
    %c0_i32 = arith.constant 0 : i32
    %101 = vector.broadcast %c0_i32 : i32 to vector<8x128xi32>
    %102 = arith.cmpi eq, %100, %101 : vector<8x128xi32>
    %c1_i32_73 = arith.constant 1 : i32
    %103 = vector.broadcast %c1_i32_73 : i32 to vector<8x128xi32>
    %104 = arith.cmpi eq, %100, %103 : vector<8x128xi32>
    %c2_i32_74 = arith.constant 2 : i32
    %105 = vector.broadcast %c2_i32_74 : i32 to vector<8x128xi32>
    %106 = arith.cmpi eq, %100, %105 : vector<8x128xi32>
    %107 = vector.shape_cast %95 : vector<8x1xf32> to vector<8x1xf32>
    %108 = vector.broadcast %107 : vector<8x1xf32> to vector<8x128xf32>
    %109 = vector.shape_cast %99 : vector<8x1xf32> to vector<8x1xf32>
    %110 = vector.broadcast %109 : vector<8x1xf32> to vector<8x128xf32>
    %111 = arith.select %106, %108, %110 : vector<8x128xi1>, vector<8x128xf32>
    %112 = vector.shape_cast %64 : vector<8x1xf32> to vector<8x1xf32>
    %113 = vector.broadcast %112 : vector<8x1xf32> to vector<8x128xf32>
    %114 = arith.select %104, %113, %111 : vector<8x128xi1>, vector<8x128xf32>
    %115 = vector.shape_cast %60 : vector<8x1xf32> to vector<8x1xf32>
    %116 = vector.broadcast %115 : vector<8x1xf32> to vector<8x128xf32>
    %117 = arith.select %102, %116, %114 : vector<8x128xi1>, vector<8x128xf32>
    %c0_75 = arith.constant 0 : index
    %c0_76 = arith.constant 0 : index
    %c0_77 = arith.constant 0 : index
    %118 = vector.load %arg7[%c0_75, %c0_76, %c0_77] : memref<1x8x128xf32, #tpu.memory_space<vmem>>, vector<1x8x128xf32>
    %119 = vector.shape_cast %118 : vector<1x8x128xf32> to vector<8x128xf32>
    %120 = vector.shape_cast %117 : vector<8x128xf32> to vector<1x8x128xf32>
    tpu.vector_store %arg7[%c0_75, %c0_76, %c0_77], %120 {strides = array<i32>} : memref<1x8x128xf32, #tpu.memory_space<vmem>>, vector<1x8x128xf32>,
    return
  }
  func.func @transform_0(%arg0: i32, %arg1: i32) -> (i32, i32, i32, i32) {
    %c0_i32 = arith.constant 0 : i32
    %c0_i32_0 = arith.constant 0 : i32
    %c0_i32_1 = arith.constant 0 : i32
    return %arg0, %c0_i32, %c0_i32_0, %arg1 : i32, i32, i32, i32
  }
  func.func @transform_1(%arg0: i32, %arg1: i32) -> (i32, i32, i32) {
    %c0_i32 = arith.constant 0 : i32
    %c0_i32_0 = arith.constant 0 : i32
    return %arg0, %c0_i32, %arg1 : i32, i32, i32
  }
  func.func @transform_2(%arg0: i32, %arg1: i32) -> (i32, i32, i32) {
    %c0_i32 = arith.constant 0 : i32
    %c0_i32_0 = arith.constant 0 : i32
    return %arg0, %c0_i32, %arg1 : i32, i32, i32
  }
  func.func @transform_3(%arg0: i32, %arg1: i32) -> (i32, i32, i32) {
    %c0_i32 = arith.constant 0 : i32
    %c0_i32_0 = arith.constant 0 : i32
    return %arg0, %c0_i32, %arg1 : i32, i32, i32
  }
  func.func @transform_4(%arg0: i32, %arg1: i32) -> (i32, i32, i32) {
    %c0_i32 = arith.constant 0 : i32
    %c0_i32_0 = arith.constant 0 : i32
    return %arg0, %c0_i32, %arg1 : i32, i32, i32
  }
  func.func @transform_5(%arg0: i32, %arg1: i32) -> (i32, i32, i32) {
    %c0_i32 = arith.constant 0 : i32
    %c0_i32_0 = arith.constant 0 : i32
    return %arg0, %c0_i32, %arg1 : i32, i32, i32
  }
}

</mosaic_0001>

<bundles_post_ra>
// kernel: glob_loss.1
= control target key start
LH: loop header
LB: loop body
LE: loop exit
PB: predicated region body
PF: predicated region fallthrough
CT: control target
= control target key end

     0   :  { %s727_s18 = smov 0   ;;  %s729_s19 = smov 0   ;;  %s779_s0 = inlined_call_operand.vmem [shape: f32[2,4,8,128], index: 0, kind: input, shape index: {}]   ;;  %s780_s1 = inlined_call_operand.vmem [shape: s32[2,8,128], index: 1, kind: input, shape index: {}]   ;;  %s781_s2 = inlined_call_operand.vmem [shape: s32[2,8,128], index: 2, kind: input, shape index: {}]   ;;  %s782_s3 = inlined_call_operand.vmem [shape: f32[2,8,128], index: 3, kind: output, shape index: {0}]   ;;  %s783_s4 = inlined_call_operand.vmem [shape: f32[2,8,128], index: 4, kind: output, shape index: {1}]   ;;  %s784_s5 = inlined_call_operand.vmem [shape: f32[2,8,128], index: 5, kind: output, shape index: {2}]  }
   0x1   :  { %s731_s20 = smov 0  }
   0x2 LB: > { %s28_s21 = sadd.s32 1, %s690_s19  ;;  %p618_p0 = scmp.ge.s32.totalorder %s694_s20, 1  ;;  %s694_s20 = sphi %s731_s20, %s16_s20   ;;  %s690_s19 = sphi %s729_s19, %s786_s19   ;;  %s686_s18 = sphi %s727_s18, %s785_s18  }
   0x3   : > { %p30_p1 = scmp.ge.s32.totalorder %s28_s21, 2  ;;  %p243_p2 = scmp.lt.s32.totalorder %s694_s20, 3 }
   0x5   : > { %s788_s21 = smov (%p30_p1, %s28_s21), 0  ;;  %p244_p3 = pnand %p618_p0, %p243_p2 }
   0x6   : > { %p304_p4 = scmp.lt.s32.totalorder (!%p244_p3), %s686_s18, 1  ;;  %v696_v38 = vmov (!%p244_p3), 0.0   ;;  %v416_v42 = vlaneseq (!%p244_p3) }
   0x7   : > { %247 = sbr.rel (%p244_p3) target bundleno = 216 (0xd8), region = 32 }
   0x8   : > { %v417_v43 = vand.u32 (!%p244_p3), 127, %v416_v42 }
   0xa   : > { %vm420_vm10 = vcmp.eq.s32.totalorder (!%p244_p3), %v417_v43, 2  ;;  %vm419_vm11 = vcmp.eq.s32.totalorder (!%p244_p3), %v417_v43, 1  ;;  %vm418_vm12 = vcmp.eq.s32.totalorder (!%p244_p3), %v417_v43, 0 }
   0xe   : > { %s790_s18 = smov (!%p304_p4, %s686_s18), 1 }
   0xf   : > { %s636_s22 = sshll.u32 %s790_s18, 5  ;;  %s748_s26 = sshll.u32 %s790_s18, 3 }
  0x10   : > { %s311_s25 = scalar_lea.vmem %s779_s0, %s636_s22  ;;  %s325_s29 = scalar_lea.vmem %s781_s2, %s748_s26 }
  0x11   : > { %v347_v0 = vld [vmem:[%s311_s25] sm:$0xff]  ;;  %v626_v1 = vld [vmem:[%s311_s25 + $0x8] sm:$0xff]  ;;  %v627_v2 = vld [vmem:[%s311_s25 + $0x10] sm:$0xff]  ;;  %s318_s7 = scalar_lea.vmem %s780_s1, %s748_s26  ;;  %s339_s10 = scalar_lea.vmem %s783_s4, %s748_s26 }
  0x12   : > { %v350_v3 = vmax.f32 %v347_v0, %v626_v1  ;;  %v628_v4 = vld [vmem:[%s311_s25 + $0x18] sm:$0xff]  ;;  %v394_v22 = vld [vmem:[%s325_s29] sm:$0xff]  ;;  %s332_s13 = scalar_lea.vmem %s782_s3, %s748_s26  ;;  %s346_s16 = scalar_lea.vmem %s784_s5, %s748_s26 }
  0x13   : > { %v375_v23 = vld [vmem:[%s318_s7] sm:$0xff]  ;;  %vm395_vm0 = vcmp.eq.s32.totalorder %v394_v22, 1  ;;  %vm398_vm2 = vcmp.eq.s32.totalorder %v394_v22, 2  ;;  %vm401_vm4 = vcmp.eq.s32.totalorder %v394_v22, 3  ;;  %vm404_vm6 = vcmp.eq.s32.totalorder %v394_v22, 255 }
  0x14   : > { %v353_v5 = vmax.f32 %v350_v3, %v627_v2  ;;  %vm376_vm1 = vcmp.eq.s32.totalorder %v375_v23, 1  ;;  %v397_v24 = vsel %vm395_vm0, %v626_v1, %v347_v0  ;;  %vm378_vm3 = vcmp.eq.s32.totalorder %v375_v23, 2 }
  0x15   : > { %v377_v25 = vsel %vm376_vm1, %v626_v1, %v347_v0  ;;  %v400_v26 = vsel %vm398_vm2, %v627_v2, %v397_v24  ;;  %vm380_vm5 = vcmp.eq.s32.totalorder %v375_v23, 3  ;;  %vm382_vm7 = vcmp.eq.s32.totalorder %v375_v23, 255 }
  0x16   : > { %v356_v6 = vmax.f32 %v353_v5, %v628_v4  ;;  %v379_v27 = vsel %vm378_vm3, %v627_v2, %v377_v25  ;;  %v403_v30 = vsel %vm401_vm4, %v628_v4, %v400_v26 }
  0x17   : > { %v381_v31 = vsel %vm380_vm5, %v628_v4, %v379_v27 }
  0x18   : > { %v357_v7 = vsub.f32 %v347_v0, %v356_v6  ;;  %v360_v8 = vsub.f32 %v626_v1, %v356_v6  ;;  %v364_v9 = vsub.f32 %v627_v2, %v356_v6  ;;  %v368_v10 = vsub.f32 %v628_v4, %v356_v6 }
  0x1a   : > { %v358_v11 = vmul.f32 1.442695, %v357_v7  ;;  %v361_v12 = vmul.f32 1.442695, %v360_v8  ;;  %v365_v13 = vmul.f32 1.442695, %v364_v9 }
  0x1b   : > { %v369_v14 = vmul.f32 1.442695, %v368_v10 }
  0x1c   : > { %662 = vpow2.f32 %v358_v11 }
  0x1d   : > { %664 = vpow2.f32 %v361_v12 }
  0x1e   : > { %666 = vpow2.f32 %v365_v13 }
  0x1f   : > { %668 = vpow2.f32 %v369_v14 }
  0x26   : > { %v663_v15 = vpop.eup %662 }
  0x27   : > { %v665_v16 = vpop.eup %664 }
  0x28   : > { %v667_v17 = vpop.eup %666  ;;  %v363_v18 = vadd.f32 %v665_v16, %v663_v15 }
  0x29   : > { %v669_v19 = vpop.eup %668 }
  0x2a   : > { %v367_v20 = vadd.f32 %v667_v17, %v363_v18 }
  0x2c   : > { %v371_v21 = vadd.f32 %v669_v19, %v367_v20 }
  0x2e   : > { %670 = vlog2.f32 %v371_v21 }
  0x38   : > { %v671_v28 = vpop.eup %670 }
  0x39   : > { %v373_v29 = vmul.f32 0.6931472, %v671_v28 }
  0x3b   : > { %v374_v32 = vadd.f32 %v373_v29, %v356_v6 }
  0x3d   : > { %v405_v33 = vsub.f32 %v374_v32, %v403_v30  ;;  %v383_v34 = vsub.f32 %v374_v32, %v381_v31 }
  0x3f   : > { %v406_v35 = vsel %vm404_vm6, 0.0, %v405_v33  ;;  %v384_v36 = vsel %vm382_vm7, 0.0, %v383_v34 }
  0x40   : > { %vm408_vm8 = vcmp.gt.f32.partialorder %v406_v35, 0.35667494  ;;  %407 = vst [vmem:[%s339_s10] sm:$0xff] %v406_v35  ;;  %vm386_vm9 = vcmp.gt.f32.partialorder %v384_v36, 0.35667494  ;;  %385 = vst [vmem:[%s332_s13] sm:$0xff] %v384_v36 }
  0x41   : > { %v409_v37 = vsel %vm408_vm8, %v406_v35, 0.0  ;;  %v629_v39 = vsel %vm386_vm9, 1.0, %v696_v38  ;;  %v633_v40 = vsel %vm408_vm8, 1.0, %v696_v38  ;;  %v387_v41 = vsel %vm386_vm9, %v384_v36, 0.0 }
  0x42   : > { %410 = vadd.xlane.f32.xlu0 %v409_v37  ;;  %392 = vadd.xlane.f32.xlu1 %v629_v39 }
  0x46   : > { %414 = vadd.xlane.f32.xlu0 %v633_v40  ;;  %388 = vadd.xlane.f32.xlu1 %v387_v41 }
  0xcf   : > { %v411_v44 = vpop.xlane.xlu0 %410  ;;  %v393_v45 = vpop.xlane.xlu1 %392 }
  0xd3   : > { %v415_v46 = vpop.xlane.xlu0 %414  ;;  %v389_v47 = vpop.xlane.xlu1 %388 }
  0xd4   : > { %v421_v48 = vsel %vm420_vm10, %v411_v44, %v415_v46 }
  0xd5   : > { %v422_v49 = vsel %vm419_vm11, %v393_v45, %v421_v48 }
  0xd6   : > { %v423_v50 = vsel %vm418_vm12, %v389_v47, %v422_v49 }
  0xd7   : > { %424 = vst [vmem:[%s346_s16] sm:$0xff] %v423_v50 }
  0xd8 PF: > { %s16_s20 = sadd.s32 1, %s694_s20   ;;  %s785_s18 = smov %s690_s19 }
  0xd9   : > { %p13_p5 = scmp.ge.s32.totalorder %s16_s20, 4   ;;  %s786_s19 = smov %s788_s21 }
  0xdb   :  { %15 = sbr.rel (!%p13_p5) target bundleno = 2 (0x2), region = 95 }

</bundles_post_ra>
